<compile_context>
chip_gen: v5e
topology: v5e:2x2
jax: 0.10.0
libtpu: 0.0.40
codegen_flags: <defaults>
</compile_context>

<pallas_src>
import jax
import jax.numpy as jnp
from jax import lax
from jax.experimental import pallas as pl
from jax.experimental.pallas import tpu as pltpu


# ------------------------------------------------------------------ helpers

def _pick_batch_tile(N):
    # v7x has 2 TensorCores/chip -> keep a >=2-wide "parallel" grid.  v5e/v6e have one
    # TC, so one grid step (batch folded into M) avoids per-step overhead and repeated
    # weight pushes.
    kind = ""
    try:
        kind = jax.devices()[0].device_kind.lower()
    except Exception:
        pass
    is_v7 = ("v7" in kind) or ("7x" in kind)
    steps = 2 if (is_v7 and N >= 2) else 1
    bt = max(1, N // steps)
    while N % bt:
        bt -= 1
    return bt


# ------------------------------------------------------------------ kernel

def fused_packed_down(x_merged, band1, t1, band2, t2, *, Cin, Cmid, Cout,
                      batch_tile=None):
    # x_merged: (N, H, W*Cin) f32 -- NHWC with W and C merged onto lanes.
    N, H, WCin = x_merged.shape
    assert WCin % Cin == 0 and H % 2 == 0
    W = WCin // Cin
    assert W % 2 == 0
    Hh, Wh = H // 2, W // 2
    K1 = (W - 1) * Cin        # H-pooled + right-neighbour-maxed row width (even chunks valid)
    K2 = Wh * Cmid            # mid-activation row width
    NO = Wh * Cout            # lane-dense output row width
    assert band1.shape == (3, K1, Wh * Cmid), band1.shape
    assert band2.shape == (3, K2, NO), band2.shape

    BT = batch_tile if batch_tile is not None else _pick_batch_tile(N)
    assert N % BT == 0
    M = BT * Hh               # matmul M dim: batch folded in

    def kernel(x_ref, w1_ref, t1_ref, w2_ref, t2_ref, o_ref, pbuf, mbuf):
        bf16 = jnp.bfloat16

        # --- per-step halo zeroing: only the two 2-row pairs bracketing the interior.
        #     (W padding + pool stride-2 selection are folded into the band weights.)
        pbuf[:, pl.ds(0, 2), :] = jnp.zeros((BT, 2, K1), bf16)
        pbuf[:, pl.ds(Hh + 2, 2), :] = jnp.zeros((BT, 2, K1), bf16)
        mbuf[:, pl.ds(0, 2), :] = jnp.zeros((BT, 2, K2), bf16)
        mbuf[:, pl.ds(Hh + 2, 2), :] = jnp.zeros((BT, 2, K2), bf16)

        # --- MaxPool2d(2): vertical max of row pairs, then horizontal max of each
        #     W column with its right neighbour; the even-column pick happens in the
        #     conv1 band weights (odd chunks are multiplied by structurally-zero rows).
        x = x_ref[...]                                           # (BT, H, W*Cin) f32
        xs = x.reshape(BT, Hh, 2, W * Cin)
        hmax = jnp.maximum(xs[:, :, 0, :], xs[:, :, 1, :])       # (BT, Hh, W*Cin)
        wmax = jnp.maximum(hmax[:, :, :K1], hmax[:, :, Cin:])    # (BT, Hh, (W-1)*Cin)
        pbuf[:, pl.ds(2, Hh), :] = wmax.astype(bf16)

        def band_conv_bn_relu(src, w_ref, t_ref, k, n):
            # src rows r+2 hold source row r; rows 1 and Hh+2 are the zero H-halo.
            acc = jnp.zeros((M, n), jnp.float32)
            for ky in range(3):                                  # 3 wide MXU dots
                lhs = src[:, ky + 1:ky + 1 + Hh, :].reshape(M, k)
                acc = acc + jnp.dot(lhs, w_ref[ky],
                                    preferred_element_type=jnp.float32)
            # BN scale already folded into the weights; epilogue is shift + ReLU only.
            return jnp.maximum(acc + t_ref[...], 0.0)

        mid = band_conv_bn_relu(pbuf, w1_ref, t1_ref, K1, Wh * Cmid)   # (M, Wh*Cmid) f32
        mbuf[:, pl.ds(2, Hh), :] = mid.reshape(BT, Hh, Wh * Cmid).astype(bf16)

        out = band_conv_bn_relu(mbuf, w2_ref, t2_ref, K2, NO)          # (M, Wh*Cout) f32
        o_ref[...] = out.reshape(BT, Hh, NO).astype(o_ref.dtype)       # lane-dense store

    return pl.pallas_call(
        kernel,
        out_shape=jax.ShapeDtypeStruct((N, Hh, NO), x_merged.dtype),
        grid=(N // BT,),
        in_specs=[
            pl.BlockSpec((BT, H, WCin), lambda n: (n, 0, 0)),
            # Grid-invariant weights/shifts.  TODO(synk): pipeline_mode=pl.Buffered(1)
            # to drop their double-buffer once VMEM gets tight at real channel counts.
            pl.BlockSpec((3, K1, Wh * Cmid), lambda n: (0, 0, 0)),
            pl.BlockSpec((1, Wh * Cmid), lambda n: (0, 0)),
            pl.BlockSpec((3, K2, NO), lambda n: (0, 0, 0)),
            pl.BlockSpec((1, NO), lambda n: (0, 0)),
        ],
        out_specs=pl.BlockSpec((BT, Hh, NO), lambda n: (n, 0, 0)),
        scratch_shapes=[
            pltpu.VMEM((BT, Hh + 4, K1), jnp.bfloat16),   # pooled activation + H halo
            pltpu.VMEM((BT, Hh + 4, K2), jnp.bfloat16),   # mid activation    + H halo
        ],
        compiler_params=pltpu.CompilerParams(dimension_semantics=("parallel",)),
    )(x_merged, band1, t1, band2, t2)


# ------------------------------------------------------------- param setup

def _fold_and_densify(w_pt, conv_bias, bn, groups, eps):
    # PyTorch grouped weight (Cout, Cin_g, 3, 3).  Fold the eval-mode BN scale into the
    # weights (f32, before any bf16 cast) and expand the packed groups to a dense
    # (3, 3, Cin, Cout) tensor with group block-diagonal channel structure.
    s = bn["weight"] / jnp.sqrt(bn["var"] + eps)
    shift = bn["bias"] + (conv_bias - bn["mean"]) * s
    wf = w_pt * s[:, None, None, None]
    Cout, Cin_g = w_pt.shape[0], w_pt.shape[1]
    G = groups
    Cout_g, Cin = Cout // G, Cin_g * G
    dense = jnp.zeros((3, 3, Cin, Cout), jnp.float32)
    wg = wf.reshape(G, Cout_g, Cin_g, 3, 3)
    for g in range(G):
        blk = jnp.transpose(wg[g], (2, 3, 1, 0))           # (3, 3, Cin_g, Cout_g)
        dense = dense.at[:, :, g * Cin_g:(g + 1) * Cin_g,
                         g * Cout_g:(g + 1) * Cout_g].set(blk)
    return dense, shift, wf.astype(jnp.bfloat16)            # ref conv uses folded bf16 too


def _band_weight(w_dense, Wh, in_stride, n_in_chunks):
    # Build the per-ky band matrix (3, n_in_chunks*Cin, Wh*Cout): output column wo reads
    # source column p = wo + kx - 1 (zero padding => rows simply absent), located at
    # input chunk in_stride*p (in_stride=2 folds the MaxPool stride-2 column selection).
    _, _, Cin, Cout = w_dense.shape
    band = jnp.zeros((3, n_in_chunks * Cin, Wh * Cout), jnp.float32)
    for kx in range(3):
        for wo in range(Wh):
            p = wo + kx - 1
            if 0 <= p < Wh:
                c = in_stride * p
                band = band.at[:, c * Cin:(c + 1) * Cin,
                               wo * Cout:(wo + 1) * Cout].set(w_dense[:, kx])
    return band.astype(jnp.bfloat16)


def init_packed_down(key, in_channels, out_channels, alpha, num_estimators, gamma,
                     eps=1e-5):
    mid_channels = out_channels            # _PackedDoubleConv default
    ext_in = int(in_channels * alpha)      # first=False
    ext_mid = int(mid_channels * alpha)    # last=False
    ext_out = int(out_channels * alpha)
    groups = gamma * num_estimators        # first=False, last=False
    # PackedConv2d's gamma-adjustment loop is a no-op when divisibility holds
    # (always true for gamma=1); assert instead of reproducing it.
    assert ext_in % groups == 0 and ext_mid % groups == 0 and ext_out % groups == 0

    ks = jax.random.split(key, 12)

    def conv_w(k, cout, cin_g):
        fan_in = cin_g * 9
        return jax.random.normal(k, (cout, cin_g, 3, 3), jnp.float32) / jnp.sqrt(fan_in)

    def bn(kw, kb, km, kv, c):
        return dict(weight=jax.random.uniform(kw, (c,), jnp.float32, 0.5, 1.5),
                    bias=0.1 * jax.random.normal(kb, (c,), jnp.float32),
                    mean=0.1 * jax.random.normal(km, (c,), jnp.float32),
                    var=jax.random.uniform(kv, (c,), jnp.float32, 0.5, 1.5))

    w1 = conv_w(ks[0], ext_mid, ext_in // groups)
    b1 = 0.1 * jax.random.normal(ks[1], (ext_mid,), jnp.float32)
    bn1 = bn(ks[2], ks[3], ks[4], ks[5], ext_mid)
    w2 = conv_w(ks[6], ext_out, ext_mid // groups)
    b2 = 0.1 * jax.random.normal(ks[7], (ext_out,), jnp.float32)
    bn2 = bn(ks[8], ks[9], ks[10], ks[11], ext_out)

    w1_dense, shift1, ref_w1 = _fold_and_densify(w1, b1, bn1, groups, eps)
    w2_dense, shift2, ref_w2 = _fold_and_densify(w2, b2, bn2, groups, eps)

    return dict(groups=groups, eps=eps,
                Cin=ext_in, Cmid=ext_mid, Cout=ext_out,
                w1_dense=w1_dense, shift1=shift1, ref_w1=ref_w1,
                w2_dense=w2_dense, shift2=shift2, ref_w2=ref_w2)


def prepare_packed_down(params, width):
    # Host-side (per spatial width): band weights + shift vectors tiled over Wh so the
    # kernel epilogue is a single broadcast add on the lane-dense (w, c) layout.
    Wh = width // 2
    Cin, Cmid, Cout = params["Cin"], params["Cmid"], params["Cout"]
    return dict(
        Cin=Cin, Cmid=Cmid, Cout=Cout,
        band1=_band_weight(params["w1_dense"], Wh, in_stride=2, n_in_chunks=width - 1),
        t1=jnp.tile(params["shift1"], Wh).reshape(1, Wh * Cmid),
        band2=_band_weight(params["w2_dense"], Wh, in_stride=1, n_in_chunks=Wh),
        t2=jnp.tile(params["shift2"], Wh).reshape(1, Wh * Cout),
    )


# --------------------------------------------------------------- forward

def packed_down_forward_nhwc(kp, x_nhwc, batch_tile=None):
    # Preferred path: NHWC in / NHWC out, only free trailing-dim reshapes (no transposes).
    N, H, W, Cin = x_nhwc.shape
    assert Cin == kp["Cin"]
    x_m = x_nhwc.reshape(N, H, W * Cin)
    out_m = fused_packed_down(x_m, kp["band1"], kp["t1"], kp["band2"], kp["t2"],
                              Cin=Cin, Cmid=kp["Cmid"], Cout=kp["Cout"],
                              batch_tile=batch_tile)
    return out_m.reshape(N, H // 2, W // 2, kp["Cout"])


def packed_down_forward(kp, x_nchw, batch_tile=None):
    # Module-exact NCHW API.  NOTE: each transpose is a full HBM read+write of the
    # activation; prefer packed_down_forward_nhwc inside an NHWC pipeline.
    x_nhwc = jnp.transpose(x_nchw, (0, 2, 3, 1))
    y = packed_down_forward_nhwc(kp, x_nhwc, batch_tile)
    return jnp.transpose(y, (0, 3, 1, 2))


def reference_forward(params, x_nchw):
    # Pure-JAX reference (reduce_window + grouped lax convs), NCHW, using the same folded
    # bf16 weights / f32 accumulation as the kernel.  Versus a pure-f32 PyTorch reference
    # the error is dominated by the intentional bf16 MXU operands (~1e-2 scale).
    G = params["groups"]

    def block(y, w_bf16, shift):
        y = lax.conv_general_dilated(
            y.astype(jnp.bfloat16), w_bf16, (1, 1), ((1, 1), (1, 1)),
            dimension_numbers=("NCHW", "OIHW", "NCHW"),
            feature_group_count=G, preferred_element_type=jnp.float32)
        return jnp.maximum(y + shift[None, :, None, None], 0.0)

    y = lax.reduce_window(x_nchw, -jnp.inf, lax.max, (1, 1, 2, 2), (1, 1, 2, 2), "VALID")
    y = block(y, params["ref_w1"], params["shift1"])
    y = block(y, params["ref_w2"], params["shift2"])
    return y


if __name__ == "__main__":
    key = jax.random.PRNGKey(0)
    in_channels, out_channels = 4, 8
    alpha, num_estimators, gamma = 2, 2, 1
    N, H, W = 2, 16, 16
    ext_in = int(in_channels * alpha)      # actual tensor channels entering the block

    k_x, k_p = jax.random.split(key)
    x_nchw = jax.random.normal(k_x, (N, ext_in, H, W), jnp.float32)
    params = init_packed_down(k_p, in_channels, out_channels, alpha, num_estimators, gamma)
    kparams = prepare_packed_down(params, W)

    # Preferred NHWC path (no wrapper transposes on the hot path).
    x_nhwc = jnp.transpose(x_nchw, (0, 2, 3, 1))
    out_nhwc = jax.block_until_ready(packed_down_forward_nhwc(kparams, x_nhwc))
    # Module-exact NCHW wrapper.
    out_nchw = jax.block_until_ready(packed_down_forward(kparams, x_nchw))

    ref = jax.block_until_ready(reference_forward(params, x_nchw))

    assert out_nchw.shape == (N, int(out_channels * alpha), H // 2, W // 2), out_nchw.shape
    assert out_nhwc.shape == (N, H // 2, W // 2, int(out_channels * alpha)), out_nhwc.shape
    err_nchw = float(jnp.max(jnp.abs(out_nchw - ref)))
    err_nhwc = float(jnp.max(jnp.abs(jnp.transpose(out_nhwc, (0, 3, 1, 2)) - ref)))
    assert max(err_nchw, err_nhwc) < 2e-2, (err_nchw, err_nhwc)
    print("KERNEL_OK")
</pallas_src>

<mosaic_0001>
module attributes {stable_mosaic.version = 11 : i64} {
  func.func @kernel(%arg0: i32, %arg1: memref<2x16x128xf32, #tpu.memory_space<vmem>>, %arg2: memref<3x120x128xbf16, #tpu.memory_space<vmem>>, %arg3: memref<1x128xf32, #tpu.memory_space<vmem>>, %arg4: memref<3x128x128xbf16, #tpu.memory_space<vmem>>, %arg5: memref<1x128xf32, #tpu.memory_space<vmem>>, %arg6: memref<2x8x128xf32, #tpu.memory_space<vmem>>, %arg7: memref<2x12x120xbf16, #tpu.memory_space<vmem>>, %arg8: memref<2x12x128xbf16, #tpu.memory_space<vmem>>) attributes {dimension_semantics = [#tpu.dimension_semantics<parallel>], iteration_bounds = array<i64: 1>, scalar_prefetch = 0 : i64, scratch_operands = 2 : i64, tpu.core_type = #tpu.core_type<tc>, window_params = [{transform_indices = @transform_0, window_bounds = array<i64: 2, 16, 128>}, {pipeline_mode = #tpu.pipeline_mode<synchronous>, transform_indices = @transform_1, window_bounds = array<i64: 3, 120, 128>}, {pipeline_mode = #tpu.pipeline_mode<synchronous>, transform_indices = @transform_2, window_bounds = array<i64: 1, 128>}, {pipeline_mode = #tpu.pipeline_mode<synchronous>, transform_indices = @transform_3, window_bounds = array<i64: 3, 128, 128>}, {pipeline_mode = #tpu.pipeline_mode<synchronous>, transform_indices = @transform_4, window_bounds = array<i64: 1, 128>}, {transform_indices = @transform_5, window_bounds = array<i64: 2, 8, 128>}]} {
    %cst = arith.constant 0.000000e+00 : bf16
    %0 = vector.broadcast %cst : bf16 to vector<2x2x120xbf16>
    %c0 = arith.constant 0 : index
    %c0_0 = arith.constant 0 : index
    %c0_1 = arith.constant 0 : index
    %1 = vector.load %arg7[%c0, %c0_0, %c0_1] : memref<2x12x120xbf16, #tpu.memory_space<vmem>>, vector<2x2x120xbf16>
    tpu.vector_store %arg7[%c0, %c0_0, %c0_1], %0 {strides = array<i32>} : memref<2x12x120xbf16, #tpu.memory_space<vmem>>, vector<2x2x120xbf16>,
    %cst_2 = arith.constant 0.000000e+00 : bf16
    %2 = vector.broadcast %cst_2 : bf16 to vector<2x2x120xbf16>
    %c0_3 = arith.constant 0 : index
    %c10 = arith.constant 10 : index
    %c0_4 = arith.constant 0 : index
    %3 = vector.load %arg7[%c0_3, %c10, %c0_4] : memref<2x12x120xbf16, #tpu.memory_space<vmem>>, vector<2x2x120xbf16>
    tpu.vector_store %arg7[%c0_3, %c10, %c0_4], %2 {strides = array<i32>} : memref<2x12x120xbf16, #tpu.memory_space<vmem>>, vector<2x2x120xbf16>,
    %cst_5 = arith.constant 0.000000e+00 : bf16
    %4 = vector.broadcast %cst_5 : bf16 to vector<2x2x128xbf16>
    %c0_6 = arith.constant 0 : index
    %c0_7 = arith.constant 0 : index
    %c0_8 = arith.constant 0 : index
    %5 = vector.load %arg8[%c0_6, %c0_7, %c0_8] : memref<2x12x128xbf16, #tpu.memory_space<vmem>>, vector<2x2x128xbf16>
    tpu.vector_store %arg8[%c0_6, %c0_7, %c0_8], %4 {strides = array<i32>} : memref<2x12x128xbf16, #tpu.memory_space<vmem>>, vector<2x2x128xbf16>,
    %cst_9 = arith.constant 0.000000e+00 : bf16
    %6 = vector.broadcast %cst_9 : bf16 to vector<2x2x128xbf16>
    %c0_10 = arith.constant 0 : index
    %c10_11 = arith.constant 10 : index
    %c0_12 = arith.constant 0 : index
    %7 = vector.load %arg8[%c0_10, %c10_11, %c0_12] : memref<2x12x128xbf16, #tpu.memory_space<vmem>>, vector<2x2x128xbf16>
    tpu.vector_store %arg8[%c0_10, %c10_11, %c0_12], %6 {strides = array<i32>} : memref<2x12x128xbf16, #tpu.memory_space<vmem>>, vector<2x2x128xbf16>,
    %c0_13 = arith.constant 0 : index
    %c0_14 = arith.constant 0 : index
    %c0_15 = arith.constant 0 : index
    %8 = vector.load %arg1[%c0_13, %c0_14, %c0_15] : memref<2x16x128xf32, #tpu.memory_space<vmem>>, vector<2x16x128xf32>
    %9 = vector.shape_cast %8 : vector<2x16x128xf32> to vector<2x8x2x128xf32>
    %10 = vector.extract_strided_slice %9 {offsets = [0, 0, 0, 0], sizes = [2, 8, 1, 128], strides = [1, 1, 1, 1]} : vector<2x8x2x128xf32> to vector<2x8x1x128xf32>
    %11 = vector.shape_cast %10 : vector<2x8x1x128xf32> to vector<2x8x128xf32>
    %12 = vector.extract_strided_slice %9 {offsets = [0, 0, 1, 0], sizes = [2, 8, 1, 128], strides = [1, 1, 1, 1]} : vector<2x8x2x128xf32> to vector<2x8x1x128xf32>
    %13 = vector.shape_cast %12 : vector<2x8x1x128xf32> to vector<2x8x128xf32>
    %14 = arith.maximumf %11, %13 : vector<2x8x128xf32>
    %15 = vector.extract_strided_slice %14 {offsets = [0, 0, 0], sizes = [2, 8, 120], strides = [1, 1, 1]} : vector<2x8x128xf32> to vector<2x8x120xf32>
    %16 = vector.extract_strided_slice %14 {offsets = [0, 0, 8], sizes = [2, 8, 120], strides = [1, 1, 1]} : vector<2x8x128xf32> to vector<2x8x120xf32>
    %17 = arith.maximumf %15, %16 : vector<2x8x120xf32>
    %18 = arith.truncf %17 : vector<2x8x120xf32> to vector<2x8x120xbf16>
    %c0_16 = arith.constant 0 : index
    %c2 = arith.constant 2 : index
    %c0_17 = arith.constant 0 : index
    %19 = vector.load %arg7[%c0_16, %c2, %c0_17] : memref<2x12x120xbf16, #tpu.memory_space<vmem>>, vector<2x8x120xbf16>
    tpu.vector_store %arg7[%c0_16, %c2, %c0_17], %18 {strides = array<i32>} : memref<2x12x120xbf16, #tpu.memory_space<vmem>>, vector<2x8x120xbf16>,
    %cst_18 = arith.constant 0.000000e+00 : f32
    %20 = vector.broadcast %cst_18 : f32 to vector<16x128xf32>
    %c0_19 = arith.constant 0 : index
    %c1 = arith.constant 1 : index
    %c0_20 = arith.constant 0 : index
    %21 = vector.load %arg7[%c0_19, %c1, %c0_20] : memref<2x12x120xbf16, #tpu.memory_space<vmem>>, vector<2x8x120xbf16>
    %22 = vector.shape_cast %21 : vector<2x8x120xbf16> to vector<16x120xbf16>
    %c0_21 = arith.constant 0 : index
    %c0_22 = arith.constant 0 : index
    %c0_23 = arith.constant 0 : index
    %23 = vector.load %arg2[%c0_21, %c0_22, %c0_23] : memref<3x120x128xbf16, #tpu.memory_space<vmem>>, vector<1x120x128xbf16>
    %24 = vector.shape_cast %23 : vector<1x120x128xbf16> to vector<120x128xbf16>
    %cst_24 = arith.constant dense<0.000000e+00> : vector<16x128xf32>
    %25 = tpu.matmul %22, %24, %cst_24 {dimension_numbers = #tpu.dot_dimension_numbers<[1], [0], [0], [1], [0, 0, 1, 1], [], []>} : vector<16x120xbf16>, vector<120x128xbf16>, vector<16x128xf32> -> vector<16x128xf32>
    %26 = arith.addf %20, %25 : vector<16x128xf32>
    %c0_25 = arith.constant 0 : index
    %c2_26 = arith.constant 2 : index
    %c0_27 = arith.constant 0 : index
    %27 = vector.load %arg7[%c0_25, %c2_26, %c0_27] : memref<2x12x120xbf16, #tpu.memory_space<vmem>>, vector<2x8x120xbf16>
    %28 = vector.shape_cast %27 : vector<2x8x120xbf16> to vector<16x120xbf16>
    %c1_28 = arith.constant 1 : index
    %c0_29 = arith.constant 0 : index
    %c0_30 = arith.constant 0 : index
    %29 = vector.load %arg2[%c1_28, %c0_29, %c0_30] : memref<3x120x128xbf16, #tpu.memory_space<vmem>>, vector<1x120x128xbf16>
    %30 = vector.shape_cast %29 : vector<1x120x128xbf16> to vector<120x128xbf16>
    %cst_31 = arith.constant dense<0.000000e+00> : vector<16x128xf32>
    %31 = tpu.matmul %28, %30, %cst_31 {dimension_numbers = #tpu.dot_dimension_numbers<[1], [0], [0], [1], [0, 0, 1, 1], [], []>} : vector<16x120xbf16>, vector<120x128xbf16>, vector<16x128xf32> -> vector<16x128xf32>
    %32 = arith.addf %26, %31 : vector<16x128xf32>
    %c0_32 = arith.constant 0 : index
    %c3 = arith.constant 3 : index
    %c0_33 = arith.constant 0 : index
    %33 = vector.load %arg7[%c0_32, %c3, %c0_33] : memref<2x12x120xbf16, #tpu.memory_space<vmem>>, vector<2x8x120xbf16>
    %34 = vector.shape_cast %33 : vector<2x8x120xbf16> to vector<16x120xbf16>
    %c2_34 = arith.constant 2 : index
    %c0_35 = arith.constant 0 : index
    %c0_36 = arith.constant 0 : index
    %35 = vector.load %arg2[%c2_34, %c0_35, %c0_36] : memref<3x120x128xbf16, #tpu.memory_space<vmem>>, vector<1x120x128xbf16>
    %36 = vector.shape_cast %35 : vector<1x120x128xbf16> to vector<120x128xbf16>
    %cst_37 = arith.constant dense<0.000000e+00> : vector<16x128xf32>
    %37 = tpu.matmul %34, %36, %cst_37 {dimension_numbers = #tpu.dot_dimension_numbers<[1], [0], [0], [1], [0, 0, 1, 1], [], []>} : vector<16x120xbf16>, vector<120x128xbf16>, vector<16x128xf32> -> vector<16x128xf32>
    %38 = arith.addf %32, %37 : vector<16x128xf32>
    %c0_38 = arith.constant 0 : index
    %c0_39 = arith.constant 0 : index
    %39 = vector.load %arg3[%c0_38, %c0_39] : memref<1x128xf32, #tpu.memory_space<vmem>>, vector<1x128xf32>
    %40 = vector.broadcast %39 : vector<1x128xf32> to vector<16x128xf32>
    %41 = arith.addf %38, %40 : vector<16x128xf32>
    %cst_40 = arith.constant 0.000000e+00 : f32
    %42 = vector.broadcast %cst_40 : f32 to vector<16x128xf32>
    %43 = arith.maximumf %41, %42 : vector<16x128xf32>
    %44 = vector.shape_cast %43 : vector<16x128xf32> to vector<2x8x128xf32>
    %45 = arith.truncf %44 : vector<2x8x128xf32> to vector<2x8x128xbf16>
    %c0_41 = arith.constant 0 : index
    %c2_42 = arith.constant 2 : index
    %c0_43 = arith.constant 0 : index
    %46 = vector.load %arg8[%c0_41, %c2_42, %c0_43] : memref<2x12x128xbf16, #tpu.memory_space<vmem>>, vector<2x8x128xbf16>
    tpu.vector_store %arg8[%c0_41, %c2_42, %c0_43], %45 {strides = array<i32>} : memref<2x12x128xbf16, #tpu.memory_space<vmem>>, vector<2x8x128xbf16>,
    %cst_44 = arith.constant 0.000000e+00 : f32
    %47 = vector.broadcast %cst_44 : f32 to vector<16x128xf32>
    %c0_45 = arith.constant 0 : index
    %c1_46 = arith.constant 1 : index
    %c0_47 = arith.constant 0 : index
    %48 = vector.load %arg8[%c0_45, %c1_46, %c0_47] : memref<2x12x128xbf16, #tpu.memory_space<vmem>>, vector<2x8x128xbf16>
    %49 = vector.shape_cast %48 : vector<2x8x128xbf16> to vector<16x128xbf16>
    %c0_48 = arith.constant 0 : index
    %c0_49 = arith.constant 0 : index
    %c0_50 = arith.constant 0 : index
    %50 = vector.load %arg4[%c0_48, %c0_49, %c0_50] : memref<3x128x128xbf16, #tpu.memory_space<vmem>>, vector<1x128x128xbf16>
    %51 = vector.shape_cast %50 : vector<1x128x128xbf16> to vector<128x128xbf16>
    %cst_51 = arith.constant dense<0.000000e+00> : vector<16x128xf32>
    %52 = tpu.matmul %49, %51, %cst_51 {dimension_numbers = #tpu.dot_dimension_numbers<[1], [0], [0], [1], [0, 0, 1, 1], [], []>} : vector<16x128xbf16>, vector<128x128xbf16>, vector<16x128xf32> -> vector<16x128xf32>
    %53 = arith.addf %47, %52 : vector<16x128xf32>
    %c0_52 = arith.constant 0 : index
    %c2_53 = arith.constant 2 : index
    %c0_54 = arith.constant 0 : index
    %54 = vector.load %arg8[%c0_52, %c2_53, %c0_54] : memref<2x12x128xbf16, #tpu.memory_space<vmem>>, vector<2x8x128xbf16>
    %55 = vector.shape_cast %54 : vector<2x8x128xbf16> to vector<16x128xbf16>
    %c1_55 = arith.constant 1 : index
    %c0_56 = arith.constant 0 : index
    %c0_57 = arith.constant 0 : index
    %56 = vector.load %arg4[%c1_55, %c0_56, %c0_57] : memref<3x128x128xbf16, #tpu.memory_space<vmem>>, vector<1x128x128xbf16>
    %57 = vector.shape_cast %56 : vector<1x128x128xbf16> to vector<128x128xbf16>
    %cst_58 = arith.constant dense<0.000000e+00> : vector<16x128xf32>
    %58 = tpu.matmul %55, %57, %cst_58 {dimension_numbers = #tpu.dot_dimension_numbers<[1], [0], [0], [1], [0, 0, 1, 1], [], []>} : vector<16x128xbf16>, vector<128x128xbf16>, vector<16x128xf32> -> vector<16x128xf32>
    %59 = arith.addf %53, %58 : vector<16x128xf32>
    %c0_59 = arith.constant 0 : index
    %c3_60 = arith.constant 3 : index
    %c0_61 = arith.constant 0 : index
    %60 = vector.load %arg8[%c0_59, %c3_60, %c0_61] : memref<2x12x128xbf16, #tpu.memory_space<vmem>>, vector<2x8x128xbf16>
    %61 = vector.shape_cast %60 : vector<2x8x128xbf16> to vector<16x128xbf16>
    %c2_62 = arith.constant 2 : index
    %c0_63 = arith.constant 0 : index
    %c0_64 = arith.constant 0 : index
    %62 = vector.load %arg4[%c2_62, %c0_63, %c0_64] : memref<3x128x128xbf16, #tpu.memory_space<vmem>>, vector<1x128x128xbf16>
    %63 = vector.shape_cast %62 : vector<1x128x128xbf16> to vector<128x128xbf16>
    %cst_65 = arith.constant dense<0.000000e+00> : vector<16x128xf32>
    %64 = tpu.matmul %61, %63, %cst_65 {dimension_numbers = #tpu.dot_dimension_numbers<[1], [0], [0], [1], [0, 0, 1, 1], [], []>} : vector<16x128xbf16>, vector<128x128xbf16>, vector<16x128xf32> -> vector<16x128xf32>
    %65 = arith.addf %59, %64 : vector<16x128xf32>
    %c0_66 = arith.constant 0 : index
    %c0_67 = arith.constant 0 : index
    %66 = vector.load %arg5[%c0_66, %c0_67] : memref<1x128xf32, #tpu.memory_space<vmem>>, vector<1x128xf32>
    %67 = vector.broadcast %66 : vector<1x128xf32> to vector<16x128xf32>
    %68 = arith.addf %65, %67 : vector<16x128xf32>
    %cst_68 = arith.constant 0.000000e+00 : f32
    %69 = vector.broadcast %cst_68 : f32 to vector<16x128xf32>
    %70 = arith.maximumf %68, %69 : vector<16x128xf32>
    %71 = vector.shape_cast %70 : vector<16x128xf32> to vector<2x8x128xf32>
    %c0_69 = arith.constant 0 : index
    %c0_70 = arith.constant 0 : index
    %c0_71 = arith.constant 0 : index
    %72 = vector.load %arg6[%c0_69, %c0_70, %c0_71] : memref<2x8x128xf32, #tpu.memory_space<vmem>>, vector<2x8x128xf32>
    tpu.vector_store %arg6[%c0_69, %c0_70, %c0_71], %71 {strides = array<i32>} : memref<2x8x128xf32, #tpu.memory_space<vmem>>, vector<2x8x128xf32>,
    return
  }
  func.func @transform_0(%arg0: i32) -> (i32, i32, i32) {
    %c0_i32 = arith.constant 0 : i32
    %c0_i32_0 = arith.constant 0 : i32
    %c0_i32_1 = arith.constant 0 : i32
    return %arg0, %c0_i32, %c0_i32_0 : i32, i32, i32
  }
  func.func @transform_1(%arg0: i32) -> (i32, i32, i32) {
    %c0_i32 = arith.constant 0 : i32
    %c0_i32_0 = arith.constant 0 : i32
    %c0_i32_1 = arith.constant 0 : i32
    %c0_i32_2 = arith.constant 0 : i32
    return %c0_i32, %c0_i32_0, %c0_i32_1 : i32, i32, i32
  }
  func.func @transform_2(%arg0: i32) -> (i32, i32) {
    %c0_i32 = arith.constant 0 : i32
    %c0_i32_0 = arith.constant 0 : i32
    %c0_i32_1 = arith.constant 0 : i32
    return %c0_i32, %c0_i32_0 : i32, i32
  }
  func.func @transform_3(%arg0: i32) -> (i32, i32, i32) {
    %c0_i32 = arith.constant 0 : i32
    %c0_i32_0 = arith.constant 0 : i32
    %c0_i32_1 = arith.constant 0 : i32
    %c0_i32_2 = arith.constant 0 : i32
    return %c0_i32, %c0_i32_0, %c0_i32_1 : i32, i32, i32
  }
  func.func @transform_4(%arg0: i32) -> (i32, i32) {
    %c0_i32 = arith.constant 0 : i32
    %c0_i32_0 = arith.constant 0 : i32
    %c0_i32_1 = arith.constant 0 : i32
    return %c0_i32, %c0_i32_0 : i32, i32
  }
  func.func @transform_5(%arg0: i32) -> (i32, i32, i32) {
    %c0_i32 = arith.constant 0 : i32
    %c0_i32_0 = arith.constant 0 : i32
    %c0_i32_1 = arith.constant 0 : i32
    return %arg0, %c0_i32, %c0_i32_0 : i32, i32, i32
  }
}

</mosaic_0001>

<bundles_post_ra>
// kernel: tpu_custom_call.1
= control target key start
LH: loop header
LB: loop body
LE: loop exit
PB: predicated region body
PF: predicated region fallthrough
CT: control target
= control target key end

     0   :  { %10 = vsyncpa [#allocation5], 0  ;;  %s1686_s0 = inlined_call_operand.hbm [shape: f32[2,16,128], index: 0, kind: input, shape index: {}]   ;;  %s1687_s1 = inlined_call_operand.hbm [shape: bf16[3,120,128], index: 1, kind: input, shape index: {}]   ;;  %s1688_s2 = inlined_call_operand.vmem [shape: f32[1,128], index: 2, kind: input, shape index: {}]   ;;  %s1689_s3 = inlined_call_operand.hbm [shape: bf16[3,128,128], index: 3, kind: input, shape index: {}]   ;;  %s1690_s4 = inlined_call_operand.vmem [shape: f32[1,128], index: 4, kind: input, shape index: {}]   ;;  %s1691_s5 = inlined_call_operand.hbm [shape: f32[2,8,128], index: 5, kind: output, shape index: {}]  }
   0x1   :  { %11 = vsyncpa [#allocation8], 0  ;;  %s30_s20 = sshll.u32 %s1687_s1, 4  ;;  %s31_s20 = int_to_ptr.hbm [resolvable:$true] %s30_s20 }
   0x2   :  { %12 = vsyncpa [#allocation6], 0  ;;  %s1486_s21 = smov [#allocation7]   ;;  %s17_s25 = sshll.u32 %s1686_s0, 4  ;;  %s18_s25 = int_to_ptr.hbm [resolvable:$true] %s17_s25 }
   0x3   :  { %s32_s22 = sshll.u32 %s1486_s21, 4  ;;  %s1487_s26 = smov 64   ;;  %s33_s22 = int_to_ptr.vmem [resolvable:$true] %s32_s22 }
   0x4   :  { %s1488_s27 = smov 4   ;;  %s1489_s28 = smov [#allocation4]  }
   0x5   :  { %38 = dma.hbm_to_vmem [thread:$0]  %s31_s20, 2880, %s33_s22, [#allocation8], %s1487_s26, %s1487_s26, %s1488_s27  }
   0x6   :  { %s19_s29 = sshll.u32 %s1489_s28, 4  ;;  %s1490_s30 = smov 128   ;;  %s20_s29 = int_to_ptr.vmem [resolvable:$true] %s19_s29 }
   0x7   :  { %s1491_s6 = smov 8   ;;  %s45_s8 = sshll.u32 %s1689_s3, 4  ;;  %s46_s8 = int_to_ptr.hbm [resolvable:$true] %s45_s8 }
   0x8   :  { %25 = dma.hbm_to_vmem [thread:$0]  %s18_s25, 512, %s20_s29, [#allocation5], %s1490_s30, %s1490_s30, %s1491_s6  }
   0x9   :  { %s1492_s9 = smov [#allocation9]  }
   0xa   :  { %s47_s0 = sshll.u32 %s1492_s9, 4  ;;  %s48_s0 = int_to_ptr.vmem [resolvable:$true] %s47_s0 }
   0xb   :  { %53 = dma.hbm_to_vmem [thread:$0]  %s46_s8, 3072, %s48_s0, [#allocation8], %s1487_s26, %s1487_s26, %s1488_s27  }
   0xc   :  { %1480 = dma.done.wait [#allocation5], 512  }
   0xd   :  { %1481 = vsyncadd [#allocation5], 4294966784 }
   0xe   :  { %1482 = dma.done.wait [#allocation8], 5952  }
   0xf   :  { %1483 = vsyncadd [#allocation8], 4294961344  ;;  %v79_v0 = vld [vmem:[#allocation4] sm:$0xff]  ;;  %v81_v1 = vld [vmem:[#allocation4 + $0x10] sm:$0xff]  ;;  %s1493_s3 = smov 120   ;;  %vm483_vm0 = vcmask 1043456  }
  0x10   :  { %v88_v2 = vrot.slane %v79_v0, 4  ;;  %v94_v3 = vrot.slane %v81_v1, 4  ;;  %v87_v4 = vrot.slane %v79_v0, 2  ;;  %v1084_v5 = vrot.slane %v79_v0, 9  ;;  %v80_v17 = vld [vmem:[#allocation4 + $0x8] sm:$0xff]  ;;  %v82_v21 = vld [vmem:[#allocation4 + $0x18] sm:$0xff] }
  0x11   :  { %v89_v6 = vrot.slane %v79_v0, 6  ;;  %v95_v7 = vrot.slane %v81_v1, 6  ;;  %v93_v8 = vrot.slane %v81_v1, 2  ;;  %v1092_v9 = vrot.slane %v81_v1, 9  ;;  %v430_v56 = vld [vmem:[#allocation7 + $0x74] sm:$0xf] }
  0x12   :  { %v1086_v10 = vrot.slane %v88_v2, 9  ;;  %v1094_v11 = vrot.slane %v94_v3, 9  ;;  %v1085_v12 = vrot.slane %v87_v4, 9  ;;  %v1538_v13 = vmax.f32 %v79_v0, %v1084_v5  ;;  %v397_v58 = vld [vmem:[#allocation7 + $0x38] sm:$0xf]  ;;  %s1495_s13 = smov [#allocation10]  }
  0x13   :  { %v1087_v14 = vrot.slane %v89_v6, 9  ;;  %v1095_v15 = vrot.slane %v95_v7, 9  ;;  %v1093_v16 = vrot.slane %v93_v8, 9  ;;  %v1550_v24 = vmax.f32 %v81_v1, %v1092_v9  ;;  %v625_v61 = vld [vmem:[#allocation7 + $0xb0] sm:$0xf]  ;;  %v1292_v9 = vld [vmem:[#allocation7 + $0x28] sm:$0xff] }
  0x14   :  { %v1540_v18 = vmax.f32 %v88_v2, %v1086_v10  ;;  %v1542_v19 = vmax.f32 %v94_v3, %v1094_v11  ;;  %v1544_v20 = vmax.f32 %v87_v4, %v1085_v12  ;;  %v92_v25 = vrot.slane %v80_v17, 6  ;;  %v1300_v3 = vld [vmem:[#allocation7 + $0x6c] sm:$0xff]  ;;  %v1298_v11 = vld [vmem:[#allocation7 + $0x5c] sm:$0xff]  ;;  %s1068_s14 = sshll.u32 %s1495_s13, 4  ;;  %s1070_s17 = sshll.u32 %s1691_s5, 4  ;;  %s1069_s14 = int_to_ptr.vmem [resolvable:$true] %s1068_s14  ;;  %s1071_s17 = int_to_ptr.hbm [resolvable:$true] %s1070_s17 }
  0x15   :  { %v1552_v26 = vmax.f32 %v89_v6, %v1087_v14  ;;  %v1554_v27 = vmax.f32 %v95_v7, %v1095_v15  ;;  %v1556_v28 = vmax.f32 %v93_v8, %v1093_v16  ;;  %v98_v29 = vrot.slane %v82_v21, 6  ;;  %v1293_v6 = vld [vmem:[#allocation7 + $0x30] sm:$0xff]  ;;  %v1299_v7 = vld [vmem:[#allocation7 + $0x64] sm:$0xff] }
  0x16   :  { %v1357_v22 = vpack.i.bf16 %v1542_v19, %v1540_v18  ;;  %v1347_v23 = vpack.i.bf16 %v1544_v20, %v1538_v13  ;;  %v91_v30 = vrot.slane %v80_v17, 4  ;;  %v97_v31 = vrot.slane %v82_v21, 4  ;;  %v1307_v8 = vld [vmem:[#allocation7 + $0xa8] sm:$0xff]  ;;  %v1306_v12 = vld [vmem:[#allocation7 + $0xa0] sm:$0xff] }
  0x17   :  { %v1088_v32 = vrot.slane %v80_v17, 9  ;;  %v1096_v33 = vrot.slane %v82_v21, 9  ;;  %v90_v34 = vrot.slane %v80_v17, 2  ;;  %v96_v35 = vrot.slane %v82_v21, 2  ;;  %v1291_v16 = vld [vmem:[#allocation7 + $0x20] sm:$0xff] }
  0x18   :  { %1358 = vrot.lane.b32.xlu1 %v1357_v22, %s1493_s3  ;;  %1348 = vrot.lane.b32.xlu0 %v1347_v23, %s1493_s3  ;;  %v1091_v36 = vrot.slane %v92_v25, 9  ;;  %v1362_v39 = vpack.i.bf16 %v1554_v27, %v1552_v26  ;;  %v1352_v40 = vpack.i.bf16 %v1556_v28, %v1550_v24  ;;  %v1099_v43 = vrot.slane %v98_v29, 9  ;;  %v1297_v22 = vld [vmem:[#allocation7 + $0x54] sm:$0xff] }
  0x19   :  { %v1560_v37 = vmax.f32 %v80_v17, %v1088_v32  ;;  %v1562_v38 = vmax.f32 %v82_v21, %v1096_v33  ;;  %v1089_v41 = vrot.slane %v90_v34, 9  ;;  %v1097_v42 = vrot.slane %v96_v35, 9  ;;  %v1305_v23 = vld [vmem:[#allocation7 + $0x98] sm:$0xff]  ;;  %v1296_v32 = vld [vmem:[#allocation7 + $0x4c] sm:$0xff] }
  0x1a   :  { %v1090_v44 = vrot.slane %v91_v30, 9  ;;  %v1098_v45 = vrot.slane %v97_v31, 9  ;;  %v1575_v49 = vmax.f32 %v92_v25, %v1091_v36  ;;  %v1579_v50 = vmax.f32 %v98_v29, %v1099_v43  ;;  %v1290_v25 = vld [vmem:[#allocation7 + $0x18] sm:$0xff] }
  0x1b   :  { %v1342_v46 = vpack.i.bf16 %v1562_v38, %v1560_v37  ;;  %v1571_v47 = vmax.f32 %v90_v34, %v1089_v41  ;;  %v1573_v48 = vmax.f32 %v96_v35, %v1097_v42  ;;  %v463_v57 = vunpack.c.l.b16 %v430_v56  ;;  %v1289_v42 = vld [vmem:[#allocation7 + $0x10] sm:$0xff] }
  0x1c   :  { %v1581_v51 = vmax.f32 %v91_v30, %v1090_v44  ;;  %v1583_v52 = vmax.f32 %v97_v31, %v1098_v45  ;;  %v1372_v54 = vpack.i.bf16 %v1579_v50, %v1575_v49  ;;  %v533_v60 = vunpack.c.l.b16 %v397_v58  ;;  %v1288_v58 = vld [vmem:[#allocation7 + $0x8] sm:$0xff] }
  0x1d   :  { %1343 = vrot.lane.b32.xlu2 %v1342_v46, %s1493_s3  ;;  %v1367_v53 = vpack.i.bf16 %v1573_v48, %v1571_v47  ;;  %v471_v59 = vpack.c.b16 %v463_v57, %v463_v57  ;;  %v658_v0 = vunpack.c.l.b16 %v625_v61  ;;  %vm69_vm1 = vcmask 974848   ;;  %v1303_v57 = vld [vmem:[#allocation7 + $0x88] sm:$0xff] }
  0x1e   :  { %v1377_v55 = vpack.i.bf16 %v1583_v52, %v1581_v51  ;;  %v541_v63 = vpack.c.b16 %v533_v60, %v533_v60  ;;  %v1494_v10 = vmov 0   ;;  %vm72_vm2 = vcmask 975873  }
  0x1f   :  { %v485_v62 = vsel %vm483_vm0, %v471_v59, 0  ;;  %v666_v4 = vpack.c.b16 %v658_v0, %v658_v0  ;;  %70 = vst.msk [vmem:[#allocation2] sm:$0x1] %vm69_vm1, %v1494_v10  ;;  %vm305_vm3 = vcmask 1043459   ;;  %vm308_vm4 = vcmask 1044484  }
  0x20   :  { %1363 = vrot.lane.b32.xlu1 %v1362_v39, %s1493_s3  ;;  %1353 = vrot.lane.b32.xlu0 %v1352_v40, %s1493_s3  ;;  %v553_v2 = vsel %vm483_vm0, %v541_v63, 0  ;;  %71 = vst.msk [vmem:[#allocation2 + $0x8] sm:$0x1] %vm69_vm1, %v1494_v10  ;;  %v1304_v39 = vld [vmem:[#allocation7 + $0x90] sm:$0xff]  ;;  %v1294_v63 = vld [vmem:[#allocation7 + $0x3c] sm:$0xff]  ;;  %vm311_vm5 = vcmask 1045509  }
  0x21   :  { %487 = vmatpush.bf16.msra.mxu0 %v485_v62  ;;  %555 = vmatpush.bf16.msra.mxu1 %v553_v2  ;;  %v678_v5 = vsel %vm483_vm0, %v666_v4, 0  ;;  %75 = vst [vmem:[#allocation3] sm:$0x1] %v1494_v10  ;;  %vm314_vm6 = vcmask 1046534   ;;  %vm317_vm7 = vcmask 1047559   ;;  %vm343_vm8 = vcmask 977921  }
  0x22   :  { %680 = vmatpush.bf16.msra.mxu2 %v678_v5  ;;  %76 = vst [vmem:[#allocation3 + $0x8] sm:$0x1] %v1494_v10  ;;  %vm320_vm9 = vcmask 1041409   ;;  %vm404_vm10 = vcmask 1042432   ;;  %vm405_vm11 = vcmask 1046532   ;;  %vm479_vm14 = vcmask 982016  }
  0x23   :  { %77 = vst [vmem:[#allocation3 + $0x4] sm:$0x2] %v1494_v10  ;;  %vm352_vm12 = vsmask.f32 3328  ;;  %vm353_vm13 = vsmask.f32 7440 }
  0x24   :  { %78 = vst [vmem:[#allocation3 + $0xc] sm:$0x2] %v1494_v10  ;;  %vm571_vm15 = vsmask.f32 2304  ;;  %vm572_vm0 = vsmask.f32 6416 }
  0x25   :  { %1368 = vrot.lane.b32.xlu2 %v1367_v53, %s1493_s3  ;;  %488 = vmatpush.bf16.msra.mxu0 %v1300_v3  ;;  %73 = vst.msk [vmem:[#allocation2 + $0x4] sm:$0x2] %vm72_vm2, %v1494_v10  ;;  %v1295_v53 = vld [vmem:[#allocation7 + $0x44] sm:$0xff] }
  0x26   :  { %556 = vmatpush.bf16.msra.mxu1 %v1293_v6  ;;  %681 = vmatpush.bf16.msra.mxu2 %v1307_v8  ;;  %74 = vst.msk [vmem:[#allocation2 + $0xc] sm:$0x2] %vm72_vm2, %v1494_v10  ;;  %vm1637_vm2 = vmor %vm352_vm12, %vm353_vm13 }
  0x28   :  { %1373 = vrot.lane.b32.xlu0 %v1372_v54, %s1493_s3  ;;  %1378 = vrot.lane.b32.xlu1 %v1377_v55, %s1493_s3 }
  0x29   :  { %489 = vmatpush.bf16.msra.mxu0 %v1299_v7  ;;  %v1287_v7 = vld [vmem:[#allocation7] sm:$0xff] }
  0x2a   :  { %557 = vmatpush.bf16.msra.mxu1 %v1292_v9  ;;  %682 = vmatpush.bf16.msra.mxu2 %v1306_v12 }
  0x2d   :  { %490 = vmatpush.bf16.msra.mxu0 %v1298_v11 }
  0x2e   :  { %558 = vmatpush.bf16.msra.mxu1 %v1291_v16  ;;  %683 = vmatpush.bf16.msra.mxu2 %v1305_v23 }
  0x31   :  { %491 = vmatpush.bf16.msra.mxu0 %v1297_v22 }
  0x32   :  { %559 = vmatpush.bf16.msra.mxu1 %v1290_v25  ;;  %684 = vmatpush.bf16.msra.mxu2 %v1304_v39 }
  0x35   :  { %492 = vmatpush.bf16.msra.mxu0 %v1296_v32 }
  0x36   :  { %560 = vmatpush.bf16.msra.mxu1 %v1289_v42  ;;  %685 = vmatpush.bf16.msra.mxu2 %v1303_v57 }
  0x39   :  { %493 = vmatpush.bf16.msra.mxu0 %v1295_v53 }
  0x3a   :  { %561 = vmatpush.bf16.msra.mxu1 %v1288_v58 }
  0x3d   :  { %494 = vmatpush.bf16.msra.mxu0 %v1294_v63 }
  0x3e   :  { %562 = vmatpush.bf16.msra.mxu1 %v1287_v7 }
  0x77   :  { %v1344_v1 = vpop.permute.xlu2 %1343 }
  0x78   :  { %v1346_v15 = vunpack.i.h.bf16 %v1344_v1  ;;  %v1345_v17 = vunpack.i.l.bf16 %v1344_v1 }
  0x7a   :  { %v251_v31 = vmax.f32 %v1562_v38, %v1346_v15  ;;  %v243_v36 = vmax.f32 %v1560_v37, %v1345_v17 }
  0x7c   :  { %v267_v46 = vpack.c.bf16 %v251_v31, %v251_v31  ;;  %v259_v56 = vpack.c.bf16 %v243_v36, %v243_v36 }
  0x7e   :  { %v1604_v2 = vunpack.c.l.b16 %v267_v46  ;;  %v291_v3 = vunpack.c.l.b16 %v259_v56 }
  0x7f   :  { %v1369_v14 = vpop.permute.xlu2 %1368 }
  0x80   :  { %v1370_v21 = vunpack.i.l.bf16 %v1369_v14  ;;  %v1371_v40 = vunpack.i.h.bf16 %v1369_v14  ;;  %v329_v17 = vrot.slane %v1604_v2, 2  ;;  %v313_v22 = vrot.slane %v291_v3, 2 }
  0x82   :  { %v244_v41 = vmax.f32 %v1571_v47, %v1370_v21  ;;  %v252_v47 = vmax.f32 %v1573_v48, %v1371_v40  ;;  %v1302_v48 = vld [vmem:[#allocation7 + $0x80] sm:$0xff] }
  0x83   :  { %686 = vmatpush.bf16.msra.mxu2 %v1302_v48 }
  0x84   :  { %v268_v9 = vpack.c.bf16 %v252_v47, %v252_v47 }
  0x86   :  { %v300_v31 = vunpack.c.l.b16 %v268_v9 }
  0x88   :  { %v331_v57 = vrot.slane %v300_v31, 1 }
  0x8a   :  { %v1359_v29 = vpop.permute.xlu1 %1358  ;;  %v1349_v30 = vpop.permute.xlu0 %1348 }
  0x8b   :  { %v1360_v33 = vunpack.i.l.bf16 %v1359_v29  ;;  %v1351_v34 = vunpack.i.h.bf16 %v1349_v30  ;;  %v1350_v35 = vunpack.i.l.bf16 %v1349_v30  ;;  %v1361_v43 = vunpack.i.h.bf16 %v1359_v29 }
  0x8d   :  { %v241_v38 = vmax.f32 %v1540_v18, %v1360_v33  ;;  %v240_v44 = vmax.f32 %v1544_v20, %v1351_v34  ;;  %v239_v45 = vmax.f32 %v1538_v13, %v1350_v35  ;;  %v249_v59 = vmax.f32 %v1542_v19, %v1361_v43 }
  0x8e   :  { %v260_v20 = vpack.c.bf16 %v244_v41, %v244_v41 }
  0x8f   :  { %v257_v37 = vpack.c.bf16 %v241_v38, %v241_v38  ;;  %v256_v54 = vpack.c.bf16 %v240_v44, %v240_v44  ;;  %v255_v55 = vpack.c.bf16 %v239_v45, %v239_v45  ;;  %v265_v8 = vpack.c.bf16 %v249_v59, %v249_v59 }
  0x90   :  { %v292_v10 = vunpack.c.l.b16 %v260_v20 }
  0x91   :  { %v288_v18 = vunpack.c.l.b16 %v256_v54  ;;  %v287_v60 = vunpack.c.l.b16 %v255_v55  ;;  %v289_v61 = vunpack.c.l.b16 %v257_v37  ;;  %v297_v30 = vunpack.c.l.b16 %v265_v8 }
  0x92   :  { %v1364_v13 = vpop.permute.xlu1 %1363  ;;  %v1354_v62 = vpop.permute.xlu0 %1353 }
  0x93   :  { %v304_v0 = vrot.slane %v288_v18, 5  ;;  %v303_v1 = vrot.slane %v287_v60, 6  ;;  %v1366_v4 = vunpack.i.h.bf16 %v1364_v13  ;;  %v1365_v19 = vunpack.i.l.bf16 %v1364_v13 }
  0x94   :  { %v1356_v5 = vunpack.i.h.bf16 %v1354_v62  ;;  %v1355_v6 = vunpack.i.l.bf16 %v1354_v62  ;;  %v307_v11 = vrot.slane %v289_v61, 4  ;;  %v325_v55 = vrot.slane %v297_v30, 4 }
  0x95   :  { %v250_v12 = vmax.f32 %v1554_v27, %v1366_v4  ;;  %v242_v14 = vmax.f32 %v1552_v26, %v1365_v19  ;;  %v306_v16 = vsel %vm305_vm3, %v304_v0, %v303_v1  ;;  %v1301_v27 = vld [vmem:[#allocation7 + $0x78] sm:$0xff] }
  0x96   :  { %v248_v15 = vmax.f32 %v1556_v28, %v1356_v5  ;;  %v247_v21 = vmax.f32 %v1550_v24, %v1355_v6  ;;  %v316_v28 = vrot.slane %v292_v10, 1  ;;  %v309_v34 = vsel %vm308_vm4, %v307_v11, %v306_v16  ;;  %687 = vmatpush.bf16.msra.mxu2 %v1301_v27 }
  0x97   :  { %v266_v23 = vpack.c.bf16 %v250_v12, %v250_v12  ;;  %v258_v25 = vpack.c.bf16 %v242_v14, %v242_v14 }
  0x98   :  { %v264_v29 = vpack.c.bf16 %v248_v15, %v248_v15  ;;  %v263_v26 = vpack.c.bf16 %v247_v21, %v247_v21 }
  0x99   :  { %v298_v32 = vunpack.c.l.b16 %v266_v23  ;;  %v290_v33 = vunpack.c.l.b16 %v258_v25 }
  0x9a   :  { %v296_v35 = vunpack.c.l.b16 %v264_v29  ;;  %v1374_v36 = vpop.permute.xlu0 %1373  ;;  %v1379_v24 = vpop.permute.xlu1 %1378  ;;  %v295_v39 = vunpack.c.l.b16 %v263_v26 }
  0x9b   :  { %v1376_v40 = vunpack.i.h.bf16 %v1374_v36  ;;  %v1375_v41 = vunpack.i.l.bf16 %v1374_v36  ;;  %v1381_v42 = vunpack.i.h.bf16 %v1379_v24  ;;  %v327_v43 = vrot.slane %v298_v32, 3 }
  0x9c   :  { %v310_v38 = vrot.slane %v290_v33, 3  ;;  %v323_v44 = vrot.slane %v296_v35, 5  ;;  %v1380_v45 = vunpack.i.l.bf16 %v1379_v24  ;;  %v322_v46 = vrot.slane %v295_v39, 6 }
  0x9d   :  { %v254_v53 = vmax.f32 %v1579_v50, %v1376_v40  ;;  %v246_v37 = vmax.f32 %v1575_v49, %v1375_v41  ;;  %v253_v54 = vmax.f32 %v1583_v52, %v1381_v42  ;;  %v1383_v40 = vld [vmem:[%s1690_s4] ss:$0 sm:$0xff] }
  0x9e   :  { %v312_v56 = vsel %vm311_vm5, %v310_v38, %v309_v34  ;;  %v245_v47 = vmax.f32 %v1581_v51, %v1380_v45  ;;  %v324_v58 = vsel %vm305_vm3, %v323_v44, %v322_v46  ;;  %vm1652_vm3 = vmor %vm571_vm15, %vm572_vm0 }
  0x9f   :  { %v315_v59 = vsel %vm314_vm6, %v313_v22, %v312_v56  ;;  %v270_v18 = vpack.c.bf16 %v254_v53, %v254_v53  ;;  %v262_v60 = vpack.c.bf16 %v246_v37, %v246_v37  ;;  %v326_v20 = vsel %vm308_vm4, %v325_v55, %v324_v58 }
  0xa0   :  { %v318_v50 = vsel %vm317_vm7, %v316_v28, %v315_v59  ;;  %v269_v61 = vpack.c.bf16 %v253_v54, %v253_v54  ;;  %v261_v49 = vpack.c.bf16 %v245_v47, %v245_v47  ;;  %v328_v52 = vsel %vm311_vm5, %v327_v43, %v326_v20 }
  0xa1   :  { %v335_v13 = vpack.c.b16 %v318_v50, %v318_v50  ;;  %v302_v62 = vunpack.c.l.b16 %v270_v18  ;;  %v294_v63 = vunpack.c.l.b16 %v262_v60  ;;  %v330_v0 = vsel %vm314_vm6, %v329_v17, %v328_v52 }
  0xa2   :  { %v301_v51 = vunpack.c.l.b16 %v269_v61  ;;  %v293_v1 = vunpack.c.l.b16 %v261_v49  ;;  %v332_v2 = vsel %vm317_vm7, %v331_v57, %v330_v0 }
  0xa3   :  { %344 = vst.msk [vmem:[#allocation2] sm:$0xe] %vm343_vm8, %v335_v13  ;;  %v333_v3 = vrot.slane %v302_v62, 7  ;;  %v319_v48 = vrot.slane %v294_v63, 7  ;;  %v337_v4 = vpack.c.b16 %v332_v2, %v332_v2 }
  0xa5   :  { %v321_v19 = vsel %vm320_vm9, %v319_v48, %v293_v1  ;;  %v334_v5 = vsel %vm320_vm9, %v333_v3, %v301_v51  ;;  %346 = vst.msk [vmem:[#allocation2 + $0x8] sm:$0xe] %vm343_vm8, %v337_v4 }
  0xa6   :  { %v336_v6 = vpack.c.b16 %v321_v19, %v321_v19  ;;  %v338_v7 = vpack.c.b16 %v334_v5, %v334_v5 }
  0xa8   :  { %345 = vst.msk [vmem:[#allocation2 + $0x4] sm:$0x1] %vm69_vm1, %v336_v6 }
  0xa9   :  { %347 = vst.msk [vmem:[#allocation2 + $0xc] sm:$0x1] %vm69_vm1, %v338_v7  ;;  %vm1631_vm1 = vmor %vm404_vm10, %vm405_vm11 }
  0xaa   :  { %v398_v8 = vld [vmem:[#allocation2] sm:$0xe] }
  0xab   :  { %v348_v9 = vld [vmem:[#allocation2] sm:$0xf]  ;;  %v575_v12 = vshrl.u32 %v398_v8, 16  ;;  %v578_v14 = vshll.u32 %v398_v8, 16  ;;  %v1100_v22 = vrot.slane %v398_v8, 9 }
  0xac   :  { %v356_v10 = vshrl.u32 %v348_v9, 16  ;;  %v359_v11 = vshll.u32 %v348_v9, 16  ;;  %v399_v15 = vld [vmem:[#allocation2 + $0x8] sm:$0xe] }
  0xad   :  { %v350_v16 = vld [vmem:[#allocation2 + $0x8] sm:$0xf]  ;;  %v1101_v23 = vrot.slane %v399_v15, 9  ;;  %v577_v28 = vrot.slane %v575_v12, 5  ;;  %v580_v32 = vrot.slane %v578_v14, 6  ;;  %v593_v43 = vshrl.u32 %v399_v15, 16 }
  0xae   :  { %v358_v17 = vrot.slane %v356_v10, 4  ;;  %v361_v21 = vrot.slane %v359_v11, 5  ;;  %v370_v25 = vshrl.u32 %v350_v16, 16  ;;  %v373_v29 = vshll.u32 %v350_v16, 16  ;;  %v1323_v12 = vld [vmem:[#allocation9 + $0x78] sm:$0xff]  ;;  %v1322_v14 = vld [vmem:[#allocation9 + $0x70] sm:$0xff] }
  0xaf   :  { %v349_v27 = vld [vmem:[#allocation2 + $0x4] sm:$0x1]  ;;  %v581_v56 = vor.u32 %v580_v32, %v577_v28  ;;  %v595_v20 = vrot.slane %v593_v43, 5  ;;  %v596_v50 = vshll.u32 %v399_v15, 16  ;;  %851 = vmatpush.bf16.msra.mxu3 %v1323_v12  ;;  %v1315_v15 = vld [vmem:[#allocation9 + $0x38] sm:$0xff]  ;;  %v1316_v43 = vld [vmem:[#allocation9 + $0x40] sm:$0xff] }
  0xb0   :  { %v362_v26 = vor.u32 %v361_v21, %v358_v17  ;;  %v569_v31 = vld [vmem:[#allocation2 + $0x4] sm:$0x3]  ;;  %v351_v33 = vld [vmem:[#allocation2 + $0xc] sm:$0x1]  ;;  %v409_v34 = vrot.slane %v349_v27, 5  ;;  %v365_v35 = vshll.u32 %v349_v27, 16  ;;  %917 = vmatpush.bf16.msrb.mxu0 %v1315_v15 }
  0xb1   :  { %v372_v36 = vrot.slane %v370_v25, 4  ;;  %v375_v24 = vrot.slane %v373_v29, 5  ;;  %v413_v39 = vrot.slane %v351_v33, 5  ;;  %v379_v42 = vshll.u32 %v351_v33, 16  ;;  %v570_v55 = vld [vmem:[#allocation2 + $0xc] sm:$0x3] }
  0xb2   :  { %v363_v41 = vrot.slane %v362_v26, 4  ;;  %v410_v38 = vsel %vm1631_vm1, %v1100_v22, %v409_v34  ;;  %v367_v44 = vrot.slane %v365_v35, 5  ;;  %v584_v46 = vshrl.u32 %v569_v31, 16  ;;  %v1331_v16 = vld [vmem:[#allocation9 + $0xb8] sm:$0xff]  ;;  %v1321_v17 = vld [vmem:[#allocation9 + $0x68] sm:$0xff]  ;;  %v1314_v21 = vld [vmem:[#allocation9 + $0x30] sm:$0xff] }
  0xb3   :  { %v376_v45 = vor.u32 %v375_v24, %v372_v36  ;;  %v414_v53 = vsel %vm1631_vm1, %v1101_v23, %v413_v39  ;;  %v431_v37 = vunpack.c.l.b16 %v410_v38  ;;  %v381_v54 = vrot.slane %v379_v42, 5  ;;  %852 = vmatpush.bf16.msra.mxu3 %v1322_v14  ;;  %1038 = vmatpush.bf16.msrb.mxu1 %v1331_v16  ;;  %v1330_v22 = vld [vmem:[#allocation9 + $0xb0] sm:$0xff]  ;;  %v1320_v23 = vld [vmem:[#allocation9 + $0x60] sm:$0xff]  ;;  %v1313_v25 = vld [vmem:[#allocation9 + $0x28] sm:$0xff] }
  0xb4   :  { %v432_v57 = vunpack.c.l.b16 %v414_v53  ;;  %v368_v47 = vsel %vm1637_vm2, %v363_v41, %v367_v44  ;;  %v586_v59 = vrot.slane %v584_v46, 5  ;;  %v587_v60 = vshll.u32 %v569_v31, 16  ;;  %918 = vmatpush.bf16.msrb.mxu0 %v1314_v21  ;;  %v1329_v29 = vld [vmem:[#allocation9 + $0xa8] sm:$0xff]  ;;  %v1319_v27 = vld [vmem:[#allocation9 + $0x58] sm:$0xff]  ;;  %v1312_v26 = vld [vmem:[#allocation9 + $0x20] sm:$0xff] }
  0xb5   :  { %v377_v58 = vrot.slane %v376_v45, 4  ;;  %v501_v18 = vunpack.c.l.b16 %v368_v47  ;;  %v602_v52 = vshrl.u32 %v570_v55, 16  ;;  %v605_v13 = vshll.u32 %v570_v55, 16  ;;  %v1328_v31 = vld [vmem:[#allocation9 + $0xa0] sm:$0xff]  ;;  %v1318_v28 = vld [vmem:[#allocation9 + $0x50] sm:$0xff]  ;;  %v1311_v32 = vld [vmem:[#allocation9 + $0x18] sm:$0xff] }
  0xb6   :  { %v433_v61 = vpack.c.b16 %v432_v57, %v431_v37  ;;  %v589_v63 = vrot.slane %v587_v60, 6  ;;  %v598_v0 = vrot.slane %v596_v50, 6  ;;  %v582_v48 = vrot.slane %v581_v56, 4  ;;  %v1327_v33 = vld [vmem:[#allocation9 + $0x98] sm:$0xff]  ;;  %v1317_v35 = vld [vmem:[#allocation9 + $0x48] sm:$0xff]  ;;  %v1310_v36 = vld [vmem:[#allocation9 + $0x10] sm:$0xff] }
  0xb7   :  { %v382_v49 = vsel %vm1637_vm2, %v377_v58, %v381_v54  ;;  %v604_v1 = vrot.slane %v602_v52, 5  ;;  %v607_v2 = vrot.slane %v605_v13, 6  ;;  %853 = vmatpush.bf16.msra.mxu3 %v1321_v17  ;;  %1039 = vmatpush.bf16.msrb.mxu1 %v1330_v22  ;;  %v1326_v39 = vld [vmem:[#allocation9 + $0x90] sm:$0xff]  ;;  %v1382_v42 = vld [vmem:[%s1688_s2] ss:$0 sm:$0xff]  ;;  %v1308_v54 = vld [vmem:[#allocation9] sm:$0xff] }
  0xb8   :  { %v502_v62 = vunpack.c.l.b16 %v382_v49  ;;  %1130 = vmatmul.msk.bf16.vlgmr.msra.gmra.mxu0 %vm479_vm14, %v433_v61  ;;  %v590_v4 = vor.u32 %v589_v63, %v586_v59  ;;  %v599_v19 = vor.u32 %v598_v0, %v595_v20  ;;  %v1309_v38 = vld [vmem:[#allocation9 + $0x8] sm:$0xff]  ;;  %v1324_v55 = vld [vmem:[#allocation9 + $0x80] sm:$0xff] }
  0xb9   :  { %v608_v5 = vor.u32 %v607_v2, %v604_v1  ;;  %919 = vmatpush.bf16.msrb.mxu0 %v1313_v25  ;;  %v1325_v45 = vld [vmem:[#allocation9 + $0x88] sm:$0xff] }
  0xba   :  { %v503_v3 = vpack.c.b16 %v502_v62, %v501_v18  ;;  %v591_v6 = vsel %vm1652_vm3, %v582_v48, %v590_v4  ;;  %v600_v7 = vrot.slane %v599_v19, 4 }
  0xbb   :  { %v626_v8 = vunpack.c.l.b16 %v591_v6  ;;  %854 = vmatpush.bf16.msra.mxu3 %v1320_v23  ;;  %1040 = vmatpush.bf16.msrb.mxu1 %v1329_v29 }
  0xbc   :  { %1159 = vmatmul.msk.bf16.vlgmr.msra.gmra.mxu1 %vm479_vm14, %v503_v3  ;;  %v609_v9 = vsel %vm1652_vm3, %v600_v7, %v608_v5 }
  0xbd   :  { %v627_v10 = vunpack.c.l.b16 %v609_v9  ;;  %920 = vmatpush.bf16.msrb.mxu0 %v1312_v26 }
  0xbf   :  { %v628_v11 = vpack.c.b16 %v627_v10, %v626_v8  ;;  %855 = vmatpush.bf16.msra.mxu3 %v1319_v27  ;;  %1041 = vmatpush.bf16.msrb.mxu1 %v1328_v31 }
  0xc1   :  { %1188 = vmatmul.msk.bf16.vlgmr.msra.gmra.mxu2 %vm479_vm14, %v628_v11  ;;  %921 = vmatpush.bf16.msrb.mxu0 %v1311_v32 }
  0xc3   :  { %856 = vmatpush.bf16.msra.mxu3 %v1318_v28  ;;  %1042 = vmatpush.bf16.msrb.mxu1 %v1327_v33 }
  0xc5   :  { %922 = vmatpush.bf16.msrb.mxu0 %v1310_v36 }
  0xc7   :  { %857 = vmatpush.bf16.msra.mxu3 %v1317_v35  ;;  %1043 = vmatpush.bf16.msrb.mxu1 %v1326_v39 }
  0xc9   :  { %923 = vmatpush.bf16.msrb.mxu0 %v1309_v38 }
  0xcb   :  { %858 = vmatpush.bf16.msra.mxu3 %v1316_v43  ;;  %1044 = vmatpush.bf16.msrb.mxu1 %v1325_v45 }
  0xcd   :  { %924 = vmatpush.bf16.msrb.mxu0 %v1308_v54 }
  0xcf   :  { %1045 = vmatpush.bf16.msrb.mxu1 %v1324_v55 }
 0x135   :  { %v496_v24 = vpop.f32.mrf.mxu0 }
 0x139   :  { %v564_v34 = vpop.f32.mrf.mxu1 }
 0x13a   :  { %v565_v41 = vadd.f32 %v564_v34, %v496_v24 }
 0x13d   :  { %v498_v57 = vpop.f32.mrf.mxu0 }
 0x141   :  { %v566_v37 = vpop.f32.mrf.mxu1 }
 0x142   :  { %v567_v47 = vadd.f32 %v566_v37, %v498_v57 }
 0x144   :  { %v689_v44 = vpop.f32.mrf.mxu2 }
 0x145   :  { %v694_v46 = vadd.f32 %v689_v44, %v565_v41 }
 0x147   :  { %v700_v53 = vadd.f32 %v1382_v42, %v694_v46 }
 0x149   :  { %v702_v56 = vmax.f32 %v700_v53, 0.0 }
 0x14b   :  { %v704_v58 = vpack.c.bf16 %v702_v56, %v702_v56 }
 0x14c   :  { %v691_v59 = vpop.f32.mrf.mxu2 }
 0x14d   :  { %v708_v18 = vrot.slane %v704_v58, 7  ;;  %v695_v60 = vadd.f32 %v691_v59, %v567_v47 }
 0x14f   :  { %v709_v20 = vrot.slane %v708_v18, 4  ;;  %716 = vst [vmem:[#allocation3] sm:$0xe] %v708_v18  ;;  %v701_v50 = vadd.f32 %v1382_v42, %v695_v60 }
 0x151   :  { %717 = vst [vmem:[#allocation3 + $0x4] sm:$0x1] %v709_v20  ;;  %v703_v61 = vmax.f32 %v701_v50, 0.0 }
 0x153   :  { %v705_v49 = vpack.c.bf16 %v703_v61, %v703_v61 }
 0x155   :  { %v710_v52 = vrot.slane %v705_v49, 7 }
 0x156   :  { %v768_v13 = vld [vmem:[#allocation3] sm:$0xe] }
 0x157   :  { %v720_v62 = vld [vmem:[#allocation3] sm:$0xf]  ;;  %v711_v63 = vrot.slane %v710_v52, 4  ;;  %718 = vst [vmem:[#allocation3 + $0x8] sm:$0xe] %v710_v52  ;;  %v934_v0 = vshrl.u32 %v768_v13, 16 }
 0x158   :  { %v937_v1 = vshll.u32 %v768_v13, 16  ;;  %v721_v2 = vld [vmem:[#allocation3 + $0x4] sm:$0x1]  ;;  %v725_v3 = vshrl.u32 %v720_v62, 16  ;;  %v728_v48 = vshll.u32 %v720_v62, 16  ;;  %v1189_v11 = vrot.slane %v768_v13, 9 }
 0x159   :  { %v931_v4 = vld [vmem:[#allocation3 + $0x4] sm:$0x3]  ;;  %719 = vst [vmem:[#allocation3 + $0xc] sm:$0x1] %v711_v63  ;;  %v734_v19 = vshll.u32 %v721_v2, 16  ;;  %v776_v5 = vrot.slane %v721_v2, 5 }
 0x15a   :  { %v936_v6 = vrot.slane %v934_v0, 5  ;;  %v727_v7 = vrot.slane %v725_v3, 4  ;;  %v730_v8 = vrot.slane %v728_v48, 5  ;;  %v939_v9 = vrot.slane %v937_v1, 6 }
 0x15b   :  { %v943_v10 = vshrl.u32 %v931_v4, 16  ;;  %v946_v12 = vshll.u32 %v931_v4, 16  ;;  %v777_v15 = vsel %vm1631_vm1, %v1189_v11, %v776_v5  ;;  %v736_v21 = vrot.slane %v734_v19, 5 }
 0x15c   :  { %v731_v14 = vor.u32 %v730_v8, %v727_v7  ;;  %v940_v22 = vor.u32 %v939_v9, %v936_v6  ;;  %v799_v28 = vunpack.c.l.b16 %v777_v15 }
 0x15d   :  { %v945_v23 = vrot.slane %v943_v10, 5  ;;  %v948_v26 = vrot.slane %v946_v12, 6 }
 0x15e   :  { %v769_v16 = vld [vmem:[#allocation3 + $0x8] sm:$0xe]  ;;  %v732_v32 = vrot.slane %v731_v14, 4  ;;  %v941_v45 = vrot.slane %v940_v22, 4 }
 0x15f   :  { %v722_v17 = vld [vmem:[#allocation3 + $0x8] sm:$0xf]  ;;  %v952_v25 = vshrl.u32 %v769_v16, 16  ;;  %v955_v29 = vshll.u32 %v769_v16, 16  ;;  %v1190_v36 = vrot.slane %v769_v16, 9  ;;  %v949_v46 = vor.u32 %v948_v26, %v945_v23 }
 0x160   :  { %v739_v27 = vshrl.u32 %v722_v17, 16  ;;  %v723_v31 = vld [vmem:[#allocation3 + $0xc] sm:$0x1]  ;;  %v742_v33 = vshll.u32 %v722_v17, 16  ;;  %v737_v57 = vsel %vm1637_vm2, %v732_v32, %v736_v21 }
 0x161   :  { %v932_v34 = vld [vmem:[#allocation3 + $0xc] sm:$0x3]  ;;  %v748_v35 = vshll.u32 %v723_v31, 16  ;;  %v780_v24 = vrot.slane %v723_v31, 5  ;;  %v954_v42 = vrot.slane %v952_v25, 5  ;;  %v957_v43 = vrot.slane %v955_v29, 6 }
 0x162   :  { %v741_v39 = vrot.slane %v739_v27, 4  ;;  %v744_v41 = vrot.slane %v742_v33, 5  ;;  %v961_v38 = vshrl.u32 %v932_v34, 16  ;;  %v964_v53 = vshll.u32 %v932_v34, 16 }
 0x163   :  { %v781_v44 = vsel %vm1631_vm1, %v1190_v36, %v780_v24  ;;  %v958_v55 = vor.u32 %v957_v43, %v954_v42  ;;  %v750_v18 = vrot.slane %v748_v35, 5  ;;  %v950_v20 = vsel %vm1652_vm3, %v941_v45, %v949_v46 }
 0x164   :  { %v800_v37 = vunpack.c.l.b16 %v781_v44  ;;  %v745_v54 = vor.u32 %v744_v41, %v741_v39  ;;  %v963_v56 = vrot.slane %v961_v38, 5  ;;  %v966_v47 = vrot.slane %v964_v53, 6 }
 0x165   :  { %v959_v60 = vrot.slane %v958_v55, 4  ;;  %v865_v61 = vunpack.c.l.b16 %v737_v57  ;;  %v986_v13 = vunpack.c.l.b16 %v950_v20 }
 0x166   :  { %v801_v58 = vpack.c.b16 %v800_v37, %v799_v28  ;;  %v746_v59 = vrot.slane %v745_v54, 4  ;;  %v967_v30 = vor.u32 %v966_v47, %v963_v56 }
 0x168   :  { %859 = vmatmul.bf16.vlgmr.msra.gmra.mxu3 %v801_v58  ;;  %v751_v50 = vsel %vm1637_vm2, %v746_v59, %v750_v18  ;;  %v968_v52 = vsel %vm1652_vm3, %v959_v60, %v967_v30 }
 0x169   :  { %v866_v49 = vunpack.c.l.b16 %v751_v50  ;;  %v987_v62 = vunpack.c.l.b16 %v968_v52 }
 0x16b   :  { %v867_v63 = vpack.c.b16 %v866_v49, %v865_v61  ;;  %v988_v0 = vpack.c.b16 %v987_v62, %v986_v13 }
 0x16d   :  { %925 = vmatmul.bf16.vlgmr.msrb.gmra.mxu0 %v867_v63  ;;  %1046 = vmatmul.bf16.vlgmr.msrb.gmra.mxu1 %v988_v0 }
 0x1ea   :  { %v926_v1 = vpop.f32.mrf.mxu0  ;;  %v1047_v2 = vpop.f32.mrf.mxu1 }
 0x1eb   :  { %v860_v3 = vpop.f32.mrf.mxu3 }
 0x1ec   :  { %v927_v48 = vadd.f32 %v926_v1, %v860_v3 }
 0x1ee   :  { %v1052_v4 = vadd.f32 %v1047_v2, %v927_v48 }
 0x1f0   :  { %v1058_v19 = vadd.f32 %v1383_v40, %v1052_v4 }
 0x1f2   :  { %v1060_v5 = vmax.f32 %v1058_v19, 0.0  ;;  %v928_v6 = vpop.f32.mrf.mxu0  ;;  %v1049_v8 = vpop.f32.mrf.mxu1 }
 0x1f3   :  { %v862_v51 = vpop.f32.mrf.mxu3 }
 0x1f4   :  { %1062 = vst [vmem:[#allocation10] sm:$0xff] %v1060_v5  ;;  %v929_v7 = vadd.f32 %v928_v6, %v862_v51 }
 0x1f6   :  { %v1053_v9 = vadd.f32 %v1049_v8, %v929_v7 }
 0x1f8   :  { %v1059_v10 = vadd.f32 %v1383_v40, %v1053_v9 }
 0x1fa   :  { %v1061_v11 = vmax.f32 %v1059_v10, 0.0 }
 0x1fc   :  { %1063 = vst [vmem:[#allocation10 + $0x8] sm:$0xff] %v1061_v11 }
 0x1fd   :  { %1076 = dma.vmem_to_hbm [thread:$0]  %s1069_s14, 256, %s1071_s17, [#allocation6], %s1490_s30, %s1490_s30, %s1491_s6  }
 0x1fe   :  { %1484 = dma.done.wait [#allocation6], 256  }
 0x1ff   :  { %1485 = vsyncadd [#allocation6], 4294967040 }
 0x200   :  { %1081 = vsyncpa [#allocation5], 1 }
 0x201   :  { %1082 = vsyncpa [#allocation8], 1 }
 0x202   :  { %1083 = vsyncpa [#allocation6], 1 }

</bundles_post_ra>
